<compile_context>
chip_gen: v5e
topology: v5e:2x2
jax: 0.10.0
libtpu: 0.0.40
codegen_flags: <defaults>
</compile_context>

<pallas_src>
import functools

import jax
import jax.numpy as jnp
from jax.experimental import pallas as pl
from jax.experimental.pallas import tpu as pltpu

LANE = 128          # TPU vreg lane width
NEG_BIG = -1e30     # finite "minus infinity" baked into the padded class bias


def mlp_kernel(x_ref, w1_ref, b1_ref, w2_ref, b2_ref, w3_ref, b3_ref, out_ref):
    # x_ref: (TM, D) f32 tile of xs rows; weights bf16 (lane-padded), biases f32.
    x = x_ref[...].astype(jnp.bfloat16)                         # VPU cast, free under MXU
    h = jnp.dot(x, w1_ref[...], preferred_element_type=jnp.float32) + b1_ref[...]
    h = jnp.maximum(h, 0.0).astype(jnp.bfloat16)                # ReLU + bf16 into MXU
    h = jnp.dot(h, w2_ref[...], preferred_element_type=jnp.float32) + b2_ref[...]
    h = jnp.maximum(h, 0.0).astype(jnp.bfloat16)
    # b3 carries -1e30 on the padded class lanes, so the masking rides the bias add.
    logits = jnp.dot(h, w3_ref[...], preferred_element_type=jnp.float32) + b3_ref[...]

    m = jnp.max(logits, axis=-1, keepdims=True)
    e = jnp.exp(logits - m)
    denom = jnp.sum(e, axis=-1, keepdims=True)
    # Reciprocal goes to the (otherwise idle) EUP slot; exact (approx=False) so
    # softmax rows sum to 1 to full f32 accuracy.
    out_ref[...] = e * pl.reciprocal(denom, approx=False)


def _round_up(x, m):
    return ((x + m - 1) // m) * m


def _has_two_tensorcores():
    """True on chips with 2 TensorCores (v7x); v5e/v6e are single-TC."""
    try:
        kind = jax.devices()[0].device_kind.lower()
    except Exception:  # pragma: no cover - defensive
        return False
    return "v7" in kind


def _choose_tm(M, tm_max, two_tc):
    """Row tile: as large as possible (<= tm_max), multiple of 8.  On 2-TC
    chips a single-tile problem is split into two balanced grid steps so both
    TensorCores get work; on single-TC chips one step avoids the second
    fixed ~0.35us grid-step overhead."""
    m8 = _round_up(M, 8)
    if m8 <= tm_max:
        if two_tc and m8 >= 16:
            return _round_up(-(-m8 // 2), 8)
        return m8
    return tm_max


def prepare_params(params):
    """One-time weight packing (call OUTSIDE the jitted forward):
      * cast weights to bf16,
      * zero-pad hidden dims H1/H2 and the class dim to a multiple of 128
        lanes (numerically exact: zero bias + ReLU keeps padded cols at 0),
      * bake the class mask into b3 (padded class lanes get -1e30)."""
    w1, b1, w2, b2, w3, b3 = params
    D, H1 = w1.shape
    H2 = w2.shape[1]
    C = w3.shape[1]
    H1P = _round_up(H1, LANE)
    H2P = _round_up(H2, LANE)
    CP = _round_up(C, LANE)

    w1p = jnp.zeros((D, H1P), jnp.bfloat16).at[:, :H1].set(w1.astype(jnp.bfloat16))
    b1p = jnp.zeros((1, H1P), jnp.float32).at[:, :H1].set(
        b1.astype(jnp.float32).reshape(1, H1))
    w2p = jnp.zeros((H1P, H2P), jnp.bfloat16).at[:H1, :H2].set(w2.astype(jnp.bfloat16))
    b2p = jnp.zeros((1, H2P), jnp.float32).at[:, :H2].set(
        b2.astype(jnp.float32).reshape(1, H2))
    w3p = jnp.zeros((H2P, CP), jnp.bfloat16).at[:H2, :C].set(w3.astype(jnp.bfloat16))
    b3p = jnp.full((1, CP), NEG_BIG, jnp.float32).at[:, :C].set(
        b3.astype(jnp.float32).reshape(1, C))
    return (w1p, b1p, w2p, b2p, w3p, b3p)


@functools.partial(jax.jit, static_argnames=("num_classes", "tm_max", "two_tc"))
def mlp_forward(xs, ys, prepped, *, num_classes, tm_max=256, two_tc=False):
    del ys  # the odd (ys_wide) rows never reach the returned prediction
    w1p, b1p, w2p, b2p, w3p, b3p = prepped
    B, P, D = xs.shape
    H1P = w1p.shape[1]
    H2P = w2p.shape[1]
    CP = w3p.shape[1]

    # Only the even (xs) rows of the interleaved sequence survive the
    # prediction[:, ::2, :] slice, so run the MLP directly on xs rows.
    M = B * P
    x2 = xs.reshape(M, D)  # free reshape; streamed into the kernel in f32

    tm = _choose_tm(M, tm_max, two_tc)
    grid = (pl.cdiv(M, tm),)

    flops = 2 * M * (D * H1P + H1P * H2P + H2P * CP)
    bytes_accessed = (
        M * D * x2.dtype.itemsize                     # activation read (f32)
        + (D * H1P + H1P * H2P + H2P * CP) * 2        # bf16 weights
        + (H1P + H2P + CP) * 4                        # f32 biases
        + M * CP * 4)                                 # f32 softmax writeback

    out = pl.pallas_call(
        mlp_kernel,
        out_shape=jax.ShapeDtypeStruct((M, CP), jnp.float32),
        grid_spec=pltpu.PrefetchScalarGridSpec(
            num_scalar_prefetch=0,
            grid=grid,
            in_specs=[
                pl.BlockSpec((tm, D), lambda i: (i, 0)),     # activations (f32)
                pl.BlockSpec((D, H1P), lambda i: (0, 0)),    # W1 (resident)
                pl.BlockSpec((1, H1P), lambda i: (0, 0)),    # b1
                pl.BlockSpec((H1P, H2P), lambda i: (0, 0)),  # W2
                pl.BlockSpec((1, H2P), lambda i: (0, 0)),    # b2
                pl.BlockSpec((H2P, CP), lambda i: (0, 0)),   # W3 (class-padded)
                pl.BlockSpec((1, CP), lambda i: (0, 0)),     # b3 (mask baked in)
            ],
            out_specs=pl.BlockSpec((tm, CP), lambda i: (i, 0)),
        ),
        compiler_params=pltpu.CompilerParams(
            dimension_semantics=("parallel",),
            vmem_limit_bytes=32 * 1024 * 1024),
        cost_estimate=pl.CostEstimate(
            flops=int(flops),
            transcendentals=int(M * CP),
            bytes_accessed=int(bytes_accessed)),
    )(x2, w1p, b1p, w2p, b2p, w3p, b3p)

    return out[:, :num_classes].reshape(B, P, num_classes)


def init_params(key, max_len, hidden_features, num_classes, dtype=jnp.float32):
    """PyTorch nn.Linear-style uniform(-1/sqrt(fan_in), 1/sqrt(fan_in)) init.
    Weights are stored transposed, i.e. (in_features, out_features)."""
    dims = [max_len] + list(hidden_features) + [num_classes]
    params = []
    for fan_in, fan_out in zip(dims[:-1], dims[1:]):
        key, kw, kb = jax.random.split(key, 3)
        bound = 1.0 / (fan_in ** 0.5)
        w = jax.random.uniform(kw, (fan_in, fan_out), dtype, -bound, bound)
        b = jax.random.uniform(kb, (1, fan_out), dtype, -bound, bound)
        params.extend([w, b])
    return tuple(params)


def combine(xs, ys):
    """JAX port of MLP._combine: interleave x rows and (widened) y rows."""
    B, P, D = xs.shape
    ys_wide = jnp.concatenate(
        [ys[..., None], jnp.zeros((B, P, D - 1), dtype=xs.dtype)], axis=2)
    return jnp.stack([xs, ys_wide], axis=2).reshape(B, 2 * P, D)


def reference_forward(xs, ys, params, *, match_kernel_precision=False):
    """Plain-JAX reference mirroring the PyTorch forward (full interleave +
    ::2 slice).  With match_kernel_precision=True, matmul inputs are rounded
    to bf16 like the kernel's stream (accumulation stays f32)."""
    w1, b1, w2, b2, w3, b3 = params

    def cast(a):
        if match_kernel_precision:
            return a.astype(jnp.bfloat16).astype(jnp.float32)
        return a

    zs = combine(xs, ys)
    h = jnp.maximum(jnp.dot(cast(zs), cast(w1)) + b1, 0.0)
    h = jnp.maximum(jnp.dot(cast(h), cast(w2)) + b2, 0.0)
    logits = jnp.dot(cast(h), cast(w3)) + b3
    pred = jax.nn.softmax(logits, axis=-1)
    return pred[:, ::2, :]


if __name__ == "__main__":
    # Small, forward-consistent shapes: batch=2, points=8, max_len(=feature
    # dim)=32, hidden_features=[64, 64], num_classes=2.
    B, P, MAX_LEN = 2, 8, 32
    HIDDEN = [64, 64]
    NUM_CLASSES = 2

    key = jax.random.PRNGKey(0)
    k_x, k_y, k_p = jax.random.split(key, 3)
    xs = jax.random.normal(k_x, (B, P, MAX_LEN), dtype=jnp.float32)
    ys = jax.random.normal(k_y, (B, P), dtype=jnp.float32)
    params = init_params(k_p, MAX_LEN, HIDDEN, NUM_CLASSES)

    # One-time weight packing (bf16 cast + lane padding), outside the jit.
    prepped = jax.tree_util.tree_map(jax.block_until_ready, prepare_params(params))
    two_tc = _has_two_tensorcores()

    out = jax.block_until_ready(
        mlp_forward(xs, ys, prepped, num_classes=NUM_CLASSES, two_tc=two_tc))
    assert out.shape == (B, P, NUM_CLASSES), out.shape

    # Tight check against a reference that matches the kernel's bf16 stream.
    ref_matched = reference_forward(xs, ys, params, match_kernel_precision=True)
    assert jnp.allclose(out, ref_matched, atol=2e-3, rtol=2e-3), \
        "mismatch vs bf16-matched reference"

    # Loose check against the full-f32 PyTorch-equivalent reference.
    ref_f32 = reference_forward(xs, ys, params)
    assert jnp.allclose(out, ref_f32, atol=5e-2, rtol=5e-2), \
        "mismatch vs f32 reference"

    print("KERNEL_OK")
</pallas_src>

<mosaic_0001>
module attributes {stable_mosaic.version = 11 : i64} {
  func.func @mlp_kernel(%arg0: i32, %arg1: memref<16x32xf32, #tpu.memory_space<vmem>>, %arg2: memref<32x128xbf16, #tpu.memory_space<vmem>>, %arg3: memref<1x128xf32, #tpu.memory_space<vmem>>, %arg4: memref<128x128xbf16, #tpu.memory_space<vmem>>, %arg5: memref<1x128xf32, #tpu.memory_space<vmem>>, %arg6: memref<128x128xbf16, #tpu.memory_space<vmem>>, %arg7: memref<1x128xf32, #tpu.memory_space<vmem>>, %arg8: memref<16x128xf32, #tpu.memory_space<vmem>>) attributes {dimension_semantics = [#tpu.dimension_semantics<parallel>], iteration_bounds = array<i64: 1>, scalar_prefetch = 0 : i64, scratch_operands = 0 : i64, tpu.core_type = #tpu.core_type<tc>, window_params = [{transform_indices = @transform_0, window_bounds = array<i64: 16, 32>}, {pipeline_mode = #tpu.pipeline_mode<synchronous>, transform_indices = @transform_1, window_bounds = array<i64: 32, 128>}, {pipeline_mode = #tpu.pipeline_mode<synchronous>, transform_indices = @transform_2, window_bounds = array<i64: 1, 128>}, {pipeline_mode = #tpu.pipeline_mode<synchronous>, transform_indices = @transform_3, window_bounds = array<i64: 128, 128>}, {pipeline_mode = #tpu.pipeline_mode<synchronous>, transform_indices = @transform_4, window_bounds = array<i64: 1, 128>}, {pipeline_mode = #tpu.pipeline_mode<synchronous>, transform_indices = @transform_5, window_bounds = array<i64: 128, 128>}, {pipeline_mode = #tpu.pipeline_mode<synchronous>, transform_indices = @transform_6, window_bounds = array<i64: 1, 128>}, {transform_indices = @transform_7, window_bounds = array<i64: 16, 128>}]} {
    %c0 = arith.constant 0 : index
    %c0_0 = arith.constant 0 : index
    %0 = vector.load %arg1[%c0, %c0_0] : memref<16x32xf32, #tpu.memory_space<vmem>>, vector<16x32xf32>
    %1 = arith.truncf %0 : vector<16x32xf32> to vector<16x32xbf16>
    %c0_1 = arith.constant 0 : index
    %c0_2 = arith.constant 0 : index
    %2 = vector.load %arg2[%c0_1, %c0_2] : memref<32x128xbf16, #tpu.memory_space<vmem>>, vector<32x128xbf16>
    %cst = arith.constant dense<0.000000e+00> : vector<16x128xf32>
    %3 = tpu.matmul %1, %2, %cst {dimension_numbers = #tpu.dot_dimension_numbers<[1], [0], [0], [1], [0, 0, 1, 1], [], []>} : vector<16x32xbf16>, vector<32x128xbf16>, vector<16x128xf32> -> vector<16x128xf32>
    %c0_3 = arith.constant 0 : index
    %c0_4 = arith.constant 0 : index
    %4 = vector.load %arg3[%c0_3, %c0_4] : memref<1x128xf32, #tpu.memory_space<vmem>>, vector<1x128xf32>
    %5 = vector.broadcast %4 : vector<1x128xf32> to vector<16x128xf32>
    %6 = arith.addf %3, %5 : vector<16x128xf32>
    %cst_5 = arith.constant 0.000000e+00 : f32
    %7 = vector.broadcast %cst_5 : f32 to vector<16x128xf32>
    %8 = arith.maximumf %6, %7 : vector<16x128xf32>
    %9 = arith.truncf %8 : vector<16x128xf32> to vector<16x128xbf16>
    %c0_6 = arith.constant 0 : index
    %c0_7 = arith.constant 0 : index
    %10 = vector.load %arg4[%c0_6, %c0_7] : memref<128x128xbf16, #tpu.memory_space<vmem>>, vector<128x128xbf16>
    %cst_8 = arith.constant dense<0.000000e+00> : vector<16x128xf32>
    %11 = tpu.matmul %9, %10, %cst_8 {dimension_numbers = #tpu.dot_dimension_numbers<[1], [0], [0], [1], [0, 0, 1, 1], [], []>} : vector<16x128xbf16>, vector<128x128xbf16>, vector<16x128xf32> -> vector<16x128xf32>
    %c0_9 = arith.constant 0 : index
    %c0_10 = arith.constant 0 : index
    %12 = vector.load %arg5[%c0_9, %c0_10] : memref<1x128xf32, #tpu.memory_space<vmem>>, vector<1x128xf32>
    %13 = vector.broadcast %12 : vector<1x128xf32> to vector<16x128xf32>
    %14 = arith.addf %11, %13 : vector<16x128xf32>
    %cst_11 = arith.constant 0.000000e+00 : f32
    %15 = vector.broadcast %cst_11 : f32 to vector<16x128xf32>
    %16 = arith.maximumf %14, %15 : vector<16x128xf32>
    %17 = arith.truncf %16 : vector<16x128xf32> to vector<16x128xbf16>
    %c0_12 = arith.constant 0 : index
    %c0_13 = arith.constant 0 : index
    %18 = vector.load %arg6[%c0_12, %c0_13] : memref<128x128xbf16, #tpu.memory_space<vmem>>, vector<128x128xbf16>
    %cst_14 = arith.constant dense<0.000000e+00> : vector<16x128xf32>
    %19 = tpu.matmul %17, %18, %cst_14 {dimension_numbers = #tpu.dot_dimension_numbers<[1], [0], [0], [1], [0, 0, 1, 1], [], []>} : vector<16x128xbf16>, vector<128x128xbf16>, vector<16x128xf32> -> vector<16x128xf32>
    %c0_15 = arith.constant 0 : index
    %c0_16 = arith.constant 0 : index
    %20 = vector.load %arg7[%c0_15, %c0_16] : memref<1x128xf32, #tpu.memory_space<vmem>>, vector<1x128xf32>
    %21 = vector.broadcast %20 : vector<1x128xf32> to vector<16x128xf32>
    %22 = arith.addf %19, %21 : vector<16x128xf32>
    %cst_17 = arith.constant dense<0xFF800000> : vector<16xf32>
    %23 = vector.multi_reduction <maximumf>, %22, %cst_17 [1] : vector<16x128xf32> to vector<16xf32>
    %24 = vector.shape_cast %23 : vector<16xf32> to vector<16x1xf32>
    %25 = vector.broadcast %24 : vector<16x1xf32> to vector<16x128xf32>
    %26 = arith.subf %22, %25 : vector<16x128xf32>
    %27 = math.exp %26 : vector<16x128xf32>
    %cst_18 = arith.constant dense<0.000000e+00> : vector<16xf32>
    %28 = vector.multi_reduction <add>, %27, %cst_18 [1] : vector<16x128xf32> to vector<16xf32>
    %29 = vector.shape_cast %28 : vector<16xf32> to vector<16x1xf32>
    %30 = tpu.reciprocal %29 : vector<16x1xf32> -> vector<16x1xf32>
    %31 = vector.broadcast %30 : vector<16x1xf32> to vector<16x128xf32>
    %32 = arith.mulf %27, %31 : vector<16x128xf32>
    %c0_19 = arith.constant 0 : index
    %c0_20 = arith.constant 0 : index
    %33 = vector.load %arg8[%c0_19, %c0_20] : memref<16x128xf32, #tpu.memory_space<vmem>>, vector<16x128xf32>
    tpu.vector_store %arg8[%c0_19, %c0_20], %32 {strides = array<i32>} : memref<16x128xf32, #tpu.memory_space<vmem>>, vector<16x128xf32>,
    return
  }
  func.func @transform_0(%arg0: i32) -> (i32, i32) {
    %c0_i32 = arith.constant 0 : i32
    %c0_i32_0 = arith.constant 0 : i32
    return %arg0, %c0_i32 : i32, i32
  }
  func.func @transform_1(%arg0: i32) -> (i32, i32) {
    %c0_i32 = arith.constant 0 : i32
    %c0_i32_0 = arith.constant 0 : i32
    %c0_i32_1 = arith.constant 0 : i32
    return %c0_i32, %c0_i32_0 : i32, i32
  }
  func.func @transform_2(%arg0: i32) -> (i32, i32) {
    %c0_i32 = arith.constant 0 : i32
    %c0_i32_0 = arith.constant 0 : i32
    %c0_i32_1 = arith.constant 0 : i32
    return %c0_i32, %c0_i32_0 : i32, i32
  }
  func.func @transform_3(%arg0: i32) -> (i32, i32) {
    %c0_i32 = arith.constant 0 : i32
    %c0_i32_0 = arith.constant 0 : i32
    %c0_i32_1 = arith.constant 0 : i32
    return %c0_i32, %c0_i32_0 : i32, i32
  }
  func.func @transform_4(%arg0: i32) -> (i32, i32) {
    %c0_i32 = arith.constant 0 : i32
    %c0_i32_0 = arith.constant 0 : i32
    %c0_i32_1 = arith.constant 0 : i32
    return %c0_i32, %c0_i32_0 : i32, i32
  }
  func.func @transform_5(%arg0: i32) -> (i32, i32) {
    %c0_i32 = arith.constant 0 : i32
    %c0_i32_0 = arith.constant 0 : i32
    %c0_i32_1 = arith.constant 0 : i32
    return %c0_i32, %c0_i32_0 : i32, i32
  }
  func.func @transform_6(%arg0: i32) -> (i32, i32) {
    %c0_i32 = arith.constant 0 : i32
    %c0_i32_0 = arith.constant 0 : i32
    %c0_i32_1 = arith.constant 0 : i32
    return %c0_i32, %c0_i32_0 : i32, i32
  }
  func.func @transform_7(%arg0: i32) -> (i32, i32) {
    %c0_i32 = arith.constant 0 : i32
    %c0_i32_0 = arith.constant 0 : i32
    return %arg0, %c0_i32 : i32, i32
  }
}

</mosaic_0001>

<bundles_post_ra>
// kernel: mlp_forward.1
= control target key start
LH: loop header
LB: loop body
LE: loop exit
PB: predicated region body
PF: predicated region fallthrough
CT: control target
= control target key end

     0   :  { %12 = vsyncpa [#allocation3], 0  ;;  %s641_s0 = inlined_call_operand.hbm [shape: f32[16,32], index: 0, kind: input, shape index: {}]   ;;  %s642_s1 = inlined_call_operand.hbm [shape: bf16[32,128], index: 1, kind: input, shape index: {}]   ;;  %s643_s2 = inlined_call_operand.vmem [shape: f32[1,128], index: 2, kind: input, shape index: {}]   ;;  %s644_s3 = inlined_call_operand.hbm [shape: bf16[128,128], index: 3, kind: input, shape index: {}]   ;;  %s645_s4 = inlined_call_operand.vmem [shape: f32[1,128], index: 4, kind: input, shape index: {}]   ;;  %s646_s5 = inlined_call_operand.hbm [shape: bf16[128,128], index: 5, kind: input, shape index: {}]   ;;  %s647_s6 = inlined_call_operand.vmem [shape: f32[1,128], index: 6, kind: input, shape index: {}]   ;;  %s648_s7 = inlined_call_operand.vmem [shape: f32[16,128], index: 7, kind: output, shape index: {}]  }
   0x1   :  { %13 = vsyncpa [#allocation5], 0  ;;  %s32_s26 = sshll.u32 %s642_s1, 4  ;;  %s33_s26 = int_to_ptr.hbm [resolvable:$true] %s32_s26 }
   0x2   :  { %14 = vsyncpa [#allocation8], 0  ;;  %s566_s27 = smov [#allocation4]   ;;  %s19_s8 = sshll.u32 %s641_s0, 4  ;;  %s20_s8 = int_to_ptr.hbm [resolvable:$true] %s19_s8 }
   0x3   :  { %s34_s28 = sshll.u32 %s566_s27, 4  ;;  %s567_s9 = smov 64   ;;  %s35_s28 = int_to_ptr.vmem [resolvable:$true] %s34_s28 }
   0x4   :  { %s568_s10 = smov 4   ;;  %s569_s11 = smov [#allocation2]  }
   0x5   :  { %40 = dma.hbm_to_vmem [thread:$0]  %s33_s26, 256, %s35_s28, [#allocation5], %s567_s9, %s567_s9, %s568_s10  }
   0x6   :  { %s21_s12 = sshll.u32 %s569_s11, 4  ;;  %s570_s13 = smov 128   ;;  %s22_s12 = int_to_ptr.vmem [resolvable:$true] %s21_s12 }
   0x7   :  { %s571_s14 = smov 8   ;;  %s47_s16 = sshll.u32 %s644_s3, 4  ;;  %s48_s16 = int_to_ptr.hbm [resolvable:$true] %s47_s16 }
   0x8   :  { %27 = dma.hbm_to_vmem [thread:$0]  %s20_s8, 256, %s22_s12, [#allocation3], %s570_s13, %s570_s13, %s571_s14  }
   0x9   :  { %s572_s17 = smov [#allocation6]   ;;  %s62_s20 = sshll.u32 %s646_s5, 4  ;;  %s63_s20 = int_to_ptr.hbm [resolvable:$true] %s62_s20 }
   0xa   :  { %s49_s18 = sshll.u32 %s572_s17, 4  ;;  %s573_s21 = smov [#allocation7]   ;;  %s50_s18 = int_to_ptr.vmem [resolvable:$true] %s49_s18 }
   0xb   :  { %55 = dma.hbm_to_vmem [thread:$0]  %s48_s16, 1024, %s50_s18, [#allocation5], %s567_s9, %s567_s9, %s568_s10  }
   0xc   :  { %s64_s22 = sshll.u32 %s573_s21, 4  ;;  %s65_s22 = int_to_ptr.vmem [resolvable:$true] %s64_s22 }
   0xd   :  { %70 = dma.hbm_to_vmem [thread:$0]  %s63_s20, 1024, %s65_s22, [#allocation8], %s567_s9, %s567_s9, %s568_s10  }
   0xe   :  { %560 = dma.done.wait [#allocation3], 256  }
   0xf   :  { %561 = vsyncadd [#allocation3], 4294967040 }
  0x10   :  { %562 = dma.done.wait [#allocation5], 1280  }
  0x11   :  { %563 = vsyncadd [#allocation5], 4294966016 }
  0x12   :  { %564 = dma.done.wait [#allocation8], 1024  }
  0x13   :  { %565 = vsyncadd [#allocation8], 4294966272  ;;  %v428_v0 = vld [vmem:[#allocation4 + $0x8] sm:$0xff]  ;;  %v427_v1 = vld [vmem:[#allocation4] sm:$0xff]  ;;  %vm113_vm0 = vcmask 261120  }
  0x14   :  { %v436_v2 = vld [vmem:[#allocation6 + $0x38] sm:$0xff]  ;;  %123 = vmatpush.bf16.msra.mxu0 %v428_v0  ;;  %v90_v3 = vld [vmem:[#allocation2] sm:$0xff]  ;;  %v91_v4 = vld [vmem:[#allocation2 + $0x8] sm:$0xff] }
  0x15   :  { %202 = vmatpush.bf16.msra.mxu1 %v436_v2  ;;  %v435_v5 = vld [vmem:[#allocation6 + $0x30] sm:$0xff]  ;;  %v92_v6 = vpack.c.bf16 %v91_v4, %v90_v3  ;;  %v434_v7 = vld [vmem:[#allocation6 + $0x28] sm:$0xff]  ;;  %v433_v8 = vld [vmem:[#allocation6 + $0x20] sm:$0xff] }
  0x16   :  { %v432_v9 = vld [vmem:[#allocation6 + $0x18] sm:$0xff]  ;;  %v431_v10 = vld [vmem:[#allocation6 + $0x10] sm:$0xff]  ;;  %v430_v11 = vld [vmem:[#allocation6 + $0x8] sm:$0xff] }
  0x17   :  { %v429_v12 = vld [vmem:[#allocation6] sm:$0xff]  ;;  %v444_v13 = vld [vmem:[#allocation7 + $0x38] sm:$0xff]  ;;  %v443_v14 = vld [vmem:[#allocation7 + $0x30] sm:$0xff] }
  0x18   :  { %124 = vmatpush.bf16.msra.mxu0 %v427_v1  ;;  %287 = vmatpush.bf16.msra.mxu2 %v444_v13  ;;  %v442_v15 = vld [vmem:[#allocation7 + $0x28] sm:$0xff]  ;;  %v441_v16 = vld [vmem:[#allocation7 + $0x20] sm:$0xff]  ;;  %v440_v25 = vld [vmem:[#allocation7 + $0x18] sm:$0xff] }
  0x19   :  { %203 = vmatpush.bf16.msra.mxu1 %v435_v5  ;;  %v453_v18 = vld [vmem:[%s643_s2] ss:$0 sm:$0xff]  ;;  %v439_v26 = vld [vmem:[#allocation7 + $0x10] sm:$0xff]  ;;  %v438_v27 = vld [vmem:[#allocation7 + $0x8] sm:$0xff] }
  0x1a   :  { %v437_v28 = vld [vmem:[#allocation7] sm:$0xff] }
  0x1b   :  { %362 = vmatmul.msk.bf16.vlgmr.msra.gmra.mxu0 %vm113_vm0, %v92_v6  ;;  %v454_v30 = vld [vmem:[%s645_s4] ss:$0 sm:$0xff] }
  0x1c   :  { %288 = vmatpush.bf16.msra.mxu2 %v443_v14  ;;  %v455_v37 = vld [vmem:[%s647_s6] ss:$0 sm:$0xff] }
  0x1d   :  { %204 = vmatpush.bf16.msra.mxu1 %v434_v7 }
  0x20   :  { %289 = vmatpush.bf16.msra.mxu2 %v442_v15 }
  0x21   :  { %205 = vmatpush.bf16.msra.mxu1 %v433_v8 }
  0x24   :  { %290 = vmatpush.bf16.msra.mxu2 %v441_v16 }
  0x25   :  { %206 = vmatpush.bf16.msra.mxu1 %v432_v9 }
  0x28   :  { %291 = vmatpush.bf16.msra.mxu2 %v440_v25 }
  0x29   :  { %207 = vmatpush.bf16.msra.mxu1 %v431_v10 }
  0x2c   :  { %292 = vmatpush.bf16.msra.mxu2 %v439_v26 }
  0x2d   :  { %208 = vmatpush.bf16.msra.mxu1 %v430_v11 }
  0x30   :  { %293 = vmatpush.bf16.msra.mxu2 %v438_v27 }
  0x31   :  { %209 = vmatpush.bf16.msra.mxu1 %v429_v12 }
  0x34   :  { %294 = vmatpush.bf16.msra.mxu2 %v437_v28 }
  0x98   :  { %v126_v17 = vpop.f32.mrf.mxu0 }
  0x99   :  { %v127_v19 = vadd.f32 %v453_v18, %v126_v17 }
  0x9b   :  { %v131_v22 = vmax.f32 %v127_v19, 0.0 }
  0xa0   :  { %v128_v20 = vpop.f32.mrf.mxu0 }
  0xa1   :  { %v129_v21 = vadd.f32 %v453_v18, %v128_v20 }
  0xa3   :  { %v132_v23 = vmax.f32 %v129_v21, 0.0 }
  0xa5   :  { %v133_v24 = vpack.c.bf16 %v132_v23, %v131_v22 }
  0xa7   :  { %210 = vmatmul.bf16.vlgmr.msra.gmra.mxu1 %v133_v24 }
 0x124   :  { %v211_v29 = vpop.f32.mrf.mxu1 }
 0x125   :  { %v212_v31 = vadd.f32 %v454_v30, %v211_v29 }
 0x127   :  { %v216_v34 = vmax.f32 %v212_v31, 0.0 }
 0x12c   :  { %v213_v32 = vpop.f32.mrf.mxu1 }
 0x12d   :  { %v214_v33 = vadd.f32 %v454_v30, %v213_v32 }
 0x12f   :  { %v217_v35 = vmax.f32 %v214_v33, 0.0 }
 0x131   :  { %v218_v36 = vpack.c.bf16 %v217_v35, %v216_v34 }
 0x133   :  { %295 = vmatmul.bf16.vlgmr.msra.gmra.mxu2 %v218_v36 }
 0x1b6   :  { %v296_v38 = vpop.f32.mrf.mxu2 }
 0x1b7   :  { %v297_v39 = vadd.f32 %v455_v37, %v296_v38 }
 0x1b9   :  { %301 = vmax.xlane.f32.xlu0 %v297_v39 }
 0x1be   :  { %v298_v40 = vpop.f32.mrf.mxu2 }
 0x1bf   :  { %v299_v41 = vadd.f32 %v455_v37, %v298_v40 }
 0x1c1   :  { %303 = vmax.xlane.f32.xlu0 %v299_v41 }
 0x22c   :  { %v302_v42 = vpop.xlane.xlu0 %301 }
 0x22d   :  { %v305_v43 = vsub.f32 %v297_v39, %v302_v42 }
 0x22f   :  { %v307_v44 = vmul.f32 1.442695, %v305_v43 }
 0x231   :  { %456 = vpow2.f32 %v307_v44 }
 0x234   :  { %v304_v45 = vpop.xlane.xlu0 %303 }
 0x235   :  { %v306_v46 = vsub.f32 %v299_v41, %v304_v45 }
 0x237   :  { %v457_v47 = vpop.eup %456  ;;  %v309_v48 = vmul.f32 1.442695, %v306_v46 }
 0x238   :  { %311 = vadd.xlane.f32.xlu1 %v457_v47 }
 0x239   :  { %458 = vpow2.f32 %v309_v48 }
 0x23f   :  { %v459_v49 = vpop.eup %458 }
 0x240   :  { %313 = vadd.xlane.f32.xlu1 %v459_v49 }
 0x2ab   :  { %v312_v50 = vpop.xlane.xlu1 %311 }
 0x2ac   :  { %460 = vrcp.f32 %v312_v50  ;;  %v326_v55 = vand.u32 2147483648, %v312_v50  ;;  %v324_v57 = vand.u32 2147483647, %v312_v50  ;;  %vm320_vm2 = vweird.f32 %v312_v50 }
 0x2ae   :  { %v327_v60 = vor.u32 1.1754944e-38, %v326_v55  ;;  %vm325_vm4 = vcmp.eq.f32.partialorder %v324_v57, 8.507059e+37 }
 0x2b2   :  { %v461_v51 = vpop.eup %460 }
 0x2b3   :  { %v316_v52 = vmul.f32 %v461_v51, %v312_v50  ;;  %v314_v53 = vpop.xlane.xlu1 %313  ;;  %vm321_vm1 = vweird.f32 %v461_v51 }
 0x2b4   :  { %462 = vrcp.f32 %v314_v53  ;;  %vm322_vm3 = vmor %vm320_vm2, %vm321_vm1  ;;  %v340_v2 = vand.u32 2147483648, %v314_v53  ;;  %v338_v4 = vand.u32 2147483647, %v314_v53  ;;  %vm334_vm6 = vweird.f32 %v314_v53 }
 0x2b5   :  { %v317_v54 = vsub.f32 1.0, %v316_v52 }
 0x2b6   :  { %v341_v6 = vor.u32 1.1754944e-38, %v340_v2  ;;  %vm339_vm8 = vcmp.eq.f32.partialorder %v338_v4, 8.507059e+37 }
 0x2b7   :  { %v318_v56 = vmul.f32 %v461_v51, %v317_v54 }
 0x2b9   :  { %v319_v58 = vadd.f32 %v461_v51, %v318_v56 }
 0x2ba   :  { %v463_v59 = vpop.eup %462 }
 0x2bb   :  { %v323_v61 = vsel %vm322_vm3, %v461_v51, %v319_v58  ;;  %v330_v62 = vmul.f32 %v463_v59, %v314_v53  ;;  %vm335_vm5 = vweird.f32 %v463_v59 }
 0x2bc   :  { %v328_v63 = vsel %vm325_vm4, %v327_v60, %v323_v61  ;;  %vm336_vm7 = vmor %vm334_vm6, %vm335_vm5 }
 0x2bd   :  { %v343_v0 = vmul.f32 %v457_v47, %v328_v63  ;;  %v331_v1 = vsub.f32 1.0, %v330_v62 }
 0x2bf   :  { %345 = vst [vmem:[%s648_s7] sm:$0xff] %v343_v0  ;;  %v332_v3 = vmul.f32 %v463_v59, %v331_v1 }
 0x2c1   :  { %v333_v5 = vadd.f32 %v463_v59, %v332_v3 }
 0x2c3   :  { %v337_v7 = vsel %vm336_vm7, %v463_v59, %v333_v5 }
 0x2c4   :  { %v342_v8 = vsel %vm339_vm8, %v341_v6, %v337_v7 }
 0x2c5   :  { %v344_v9 = vmul.f32 %v459_v49, %v342_v8 }
 0x2c7   :  { %346 = vst [vmem:[%s648_s7 + $0x8] sm:$0xff] %v344_v9 }
 0x2c8   :  { %351 = vsyncpa [#allocation3], 1 }
 0x2c9   :  { %352 = vsyncpa [#allocation5], 1 }
 0x2ca   :  { %353 = vsyncpa [#allocation8], 1 }

</bundles_post_ra>
